<compile_context>
chip_gen: v7x
topology: tpu7x:2x2x1
jax: 0.10.0
libtpu: 0.0.40
codegen_flags: <defaults>
</compile_context>

<pallas_src>
import functools

import jax
import jax.numpy as jnp
from jax.experimental import pallas as pl
from jax.experimental.pallas import tpu as pltpu

MARGIN = 2.0
LANES = 128
SUBLANES = 8
# Row-count alignment for tiles; 32 keeps (32,128)/(16,128) packed tilings
# legal for int8/bf16 streams as well as f32.
ROW_ALIGN = 32
# Below this many elements the fixed pallas_call overhead dwarfs the work.
MIN_PALLAS_ELEMENTS = 16384


def _cdiv(a, b):
    return -(-a // b)


def _round_up(x, m):
    return ((x + m - 1) // m) * m


def _tpu_config():
    """(leading grid axis size, tile-row cap) chosen per TPU generation."""
    kind = ""
    try:
        dev = jax.devices()[0]
        if dev.platform == "tpu":
            kind = str(dev.device_kind).lower()
    except Exception:  # pragma: no cover - defensive; fall through to default
        pass
    if "v7" in kind:
        # 2 TensorCores per chip; 8192 rows = 4 MiB f32 per buffer, 16 MiB
        # pipeline footprint fits the 32 MiB scoped-VMEM default with headroom.
        return 2, 8192
    if "v6" in kind:
        return 1, 8192     # single TC, 32 MiB scoped-VMEM default
    if "v5" in kind:
        return 1, 2048     # single TC, 16 MiB scoped-VMEM default: stay small
    return 1, 4096         # unknown generation: conservative middle ground


def _contrastive_loss_kernel(d_ref, label_ref, out_ref, *, margin, tile_rows):
    step = pl.program_id(1)

    @pl.when(step == 0)
    def _init():
        out_ref[...] = jnp.zeros_like(out_ref)

    # Stream in native dtype, do the math in f32.
    d = d_ref[...].astype(jnp.float32)
    lab = label_ref[...].astype(jnp.float32)

    c = jnp.maximum(margin - d, 0.0)
    c2 = c * c
    # label * d^2 + (1 - label) * c^2  ==  c^2 + label * (d^2 - c^2)
    # Padded elements (d = 0, label = 1) contribute exactly 0, so no mask.
    loss = c2 + lab * (d * d - c2)

    # Keep an (8,128) vreg-shaped partial sum resident in the output block so
    # the cross-lane reduce happens only once, in the wrapper.
    partial = loss.reshape(tile_rows // SUBLANES, SUBLANES, LANES).sum(axis=0)
    out_ref[...] += partial


def _reference(output, label, margin=MARGIN):
    d = jnp.squeeze(output).astype(jnp.float32)
    lab = label.astype(jnp.float32)
    d, lab = jnp.broadcast_arrays(d, lab)
    loss_sim = lab * d ** 2
    loss_diff = (1.0 - lab) * jnp.clip(margin - d, 0.0, None) ** 2
    return jnp.mean(0.5 * (loss_sim + loss_diff))


def contrastive_loss(output, label, margin=MARGIN, *,
                     tile_cap_rows=None, num_cores=None,
                     min_pallas_elements=MIN_PALLAS_ELEMENTS):
    """Pallas implementation of ContrastiveLoss.forward.  Returns a scalar f32."""
    d = jnp.squeeze(output)
    lab = label

    # Keep native floating dtypes (bf16 streams as bf16).  Non-float labels are
    # streamed as bf16 (exact for 0/1); anything wider than 32 bits drops to f32.
    if not jnp.issubdtype(d.dtype, jnp.floating) or d.dtype.itemsize > 4:
        d = d.astype(jnp.float32)
    if not jnp.issubdtype(lab.dtype, jnp.floating):
        lab = lab.astype(jnp.bfloat16)
    elif lab.dtype.itemsize > 4:
        lab = lab.astype(jnp.float32)
    d, lab = jnp.broadcast_arrays(d, lab)

    n_true = int(d.size)
    if n_true < max(1, min_pallas_elements):
        # Tiny problem: the XLA-fused path beats a kernel launch.
        return _reference(output, label, margin)

    auto_cores, auto_cap = _tpu_config()
    if num_cores is None:
        num_cores = auto_cores
    if tile_cap_rows is None:
        tile_cap_rows = auto_cap
    tile_cap_rows = max(ROW_ALIGN, int(tile_cap_rows))
    num_cores = max(1, int(num_cores))

    # Adaptive tiling: pick the fewest steps that respect the per-generation
    # tile cap, then size the tile to the data so padding is at most a few
    # ROW_ALIGN-row chunks (negligible DMA waste).
    rows_needed = _cdiv(n_true, LANES)
    rows_per_core = _cdiv(rows_needed, num_cores)
    steps_per_core = max(1, _cdiv(rows_per_core, tile_cap_rows))
    tile_rows = _round_up(_cdiv(rows_per_core, steps_per_core), ROW_ALIGN)
    padded_rows = tile_rows * steps_per_core * num_cores
    n_pad = padded_rows * LANES

    def to_tiles(a, pad_value):
        flat = a.reshape(-1)
        if n_pad != n_true:
            # NOTE: jnp.pad materializes a copy; it only triggers when the
            # flattened size doesn't already tile exactly, and the pad amount
            # itself is tiny (<= a few ROW_ALIGN rows per step).
            flat = jnp.pad(flat, (0, n_pad - n_true), constant_values=pad_value)
        return flat.reshape(padded_rows, LANES)

    d2 = to_tiles(d, 0.0)      # d = 0, label = 1  =>  padded loss == 0 exactly
    lab2 = to_tiles(lab, 1.0)

    kernel = functools.partial(_contrastive_loss_kernel,
                               margin=float(margin), tile_rows=tile_rows)

    in_block = pl.BlockSpec((tile_rows, LANES),
                            lambda c, i: (c * steps_per_core + i, 0))
    out_block = pl.BlockSpec((SUBLANES, LANES), lambda c, i: (c, 0))

    # VMEM budget: 2 inputs x 2 pipeline buffers x tile, plus headroom for the
    # resident accumulator and internal scratch.
    block_in_bytes = tile_rows * LANES * (d2.dtype.itemsize + lab2.dtype.itemsize)
    vmem_limit = int(min(64 << 20, max(16 << 20, 2 * block_in_bytes + (8 << 20))))

    bytes_accessed = int(d2.size * d2.dtype.itemsize
                         + lab2.size * lab2.dtype.itemsize
                         + num_cores * SUBLANES * LANES * 4)
    cost = pl.CostEstimate(flops=int(7 * n_pad), transcendentals=0,
                           bytes_accessed=bytes_accessed)

    partials = pl.pallas_call(
        kernel,
        out_shape=jax.ShapeDtypeStruct((num_cores * SUBLANES, LANES), jnp.float32),
        grid=(num_cores, steps_per_core),
        in_specs=[in_block, in_block],
        out_specs=out_block,
        compiler_params=pltpu.CompilerParams(
            dimension_semantics=("parallel", "arbitrary"),
            vmem_limit_bytes=vmem_limit),
        cost_estimate=cost,
    )(d2, lab2)

    # Single cross-lane reduce + one scalar factor fusing the 0.5 and the mean.
    return jnp.sum(partials) * (0.5 / n_true)


if __name__ == "__main__":
    key = jax.random.PRNGKey(0)
    k1, k2 = jax.random.split(key)

    # Small NC-style inputs: pairwise distances (B, 1), binary labels (B,).
    B = 8
    output = jnp.abs(jax.random.normal(k1, (B, 1), dtype=jnp.float32)) * 2.0
    label = jax.random.bernoulli(k2, p=0.5, shape=(B,)).astype(jnp.float32)

    # Force the Pallas path even at tiny B so the kernel actually executes.
    loss = contrastive_loss(output, label, min_pallas_elements=0)
    jax.block_until_ready(loss)
    ref = _reference(output, label)
    assert jnp.allclose(loss, ref, rtol=1e-5, atol=1e-6), (loss, ref)

    # Ragged size with a small tile cap to exercise padding + multi-step
    # accumulation across the "arbitrary" grid axis.
    B2 = 1000
    out2 = jnp.abs(jax.random.normal(k1, (B2, 1), dtype=jnp.float32)) * 2.0
    lab2 = jax.random.bernoulli(k2, p=0.5, shape=(B2,)).astype(jnp.float32)
    loss2 = contrastive_loss(out2, lab2, min_pallas_elements=0, tile_cap_rows=32)
    jax.block_until_ready(loss2)
    ref2 = _reference(out2, lab2)
    assert jnp.allclose(loss2, ref2, rtol=1e-5, atol=1e-6), (loss2, ref2)

    # Non-float (bool) labels: streamed as bf16, upcast in-kernel (exact for 0/1).
    lab_bool = jax.random.bernoulli(k2, p=0.5, shape=(B2,))
    loss3 = contrastive_loss(out2, lab_bool, min_pallas_elements=0)
    jax.block_until_ready(loss3)
    ref3 = _reference(out2, lab_bool)
    assert jnp.allclose(loss3, ref3, rtol=1e-5, atol=1e-6), (loss3, ref3)

    # Default path (tiny B falls back to the fused XLA expression).
    loss4 = contrastive_loss(output, label)
    jax.block_until_ready(loss4)
    assert jnp.allclose(loss4, ref, rtol=1e-5, atol=1e-6), (loss4, ref)

    print("KERNEL_OK")
</pallas_src>

<mosaic_0001>
module attributes {stable_mosaic.version = 11 : i64} {
  func.func @_contrastive_loss_kernel(%arg0: i32, %arg1: i32, %arg2: memref<32x128xf32, #tpu.memory_space<vmem>>, %arg3: memref<32x128xf32, #tpu.memory_space<vmem>>, %arg4: memref<8x128xf32, #tpu.memory_space<vmem>>) attributes {dimension_semantics = [#tpu.dimension_semantics<parallel>, #tpu.dimension_semantics<arbitrary>], iteration_bounds = array<i64: 1, 1>, scalar_prefetch = 0 : i64, scratch_operands = 0 : i64, tpu.core_type = #tpu.core_type<tc>, window_params = [{transform_indices = @transform_0, window_bounds = array<i64: 32, 128>}, {transform_indices = @transform_1, window_bounds = array<i64: 32, 128>}, {transform_indices = @transform_2, window_bounds = array<i64: 8, 128>}]} {
    %c0_i32 = arith.constant 0 : i32
    %0 = arith.cmpi eq, %arg1, %c0_i32 : i32
    %1 = arith.extui %0 : i1 to i32
    %c0_i32_0 = arith.constant 0 : i32
    %2 = arith.cmpi ne, %1, %c0_i32_0 : i32
    scf.if %2 {
      %cst_10 = arith.constant 0.000000e+00 : f32
      %19 = vector.broadcast %cst_10 : f32 to vector<8x128xf32>
      %c0_11 = arith.constant 0 : index
      %c0_12 = arith.constant 0 : index
      %20 = vector.load %arg4[%c0_11, %c0_12] : memref<8x128xf32, #tpu.memory_space<vmem>>, vector<8x128xf32>
      tpu.vector_store %arg4[%c0_11, %c0_12], %19 {strides = array<i32>} : memref<8x128xf32, #tpu.memory_space<vmem>>, vector<8x128xf32>,
    } else {
    }
    %c0 = arith.constant 0 : index
    %c0_1 = arith.constant 0 : index
    %3 = vector.load %arg2[%c0, %c0_1] : memref<32x128xf32, #tpu.memory_space<vmem>>, vector<32x128xf32>
    %c0_2 = arith.constant 0 : index
    %c0_3 = arith.constant 0 : index
    %4 = vector.load %arg3[%c0_2, %c0_3] : memref<32x128xf32, #tpu.memory_space<vmem>>, vector<32x128xf32>
    %cst = arith.constant 2.000000e+00 : f32
    %5 = vector.broadcast %cst : f32 to vector<32x128xf32>
    %6 = arith.subf %5, %3 : vector<32x128xf32>
    %cst_4 = arith.constant 0.000000e+00 : f32
    %7 = vector.broadcast %cst_4 : f32 to vector<32x128xf32>
    %8 = arith.maximumf %6, %7 : vector<32x128xf32>
    %9 = arith.mulf %8, %8 : vector<32x128xf32>
    %10 = arith.mulf %3, %3 : vector<32x128xf32>
    %11 = arith.subf %10, %9 : vector<32x128xf32>
    %12 = arith.mulf %4, %11 : vector<32x128xf32>
    %13 = arith.addf %9, %12 : vector<32x128xf32>
    %14 = vector.shape_cast %13 : vector<32x128xf32> to vector<4x8x128xf32>
    %cst_5 = arith.constant dense<0.000000e+00> : vector<8x128xf32>
    %15 = vector.multi_reduction <add>, %14, %cst_5 [0] : vector<4x8x128xf32> to vector<8x128xf32>
    %c0_6 = arith.constant 0 : index
    %c0_7 = arith.constant 0 : index
    %16 = vector.load %arg4[%c0_6, %c0_7] : memref<8x128xf32, #tpu.memory_space<vmem>>, vector<8x128xf32>
    %17 = arith.addf %16, %15 : vector<8x128xf32>
    %c0_8 = arith.constant 0 : index
    %c0_9 = arith.constant 0 : index
    %18 = vector.load %arg4[%c0_8, %c0_9] : memref<8x128xf32, #tpu.memory_space<vmem>>, vector<8x128xf32>
    tpu.vector_store %arg4[%c0_8, %c0_9], %17 {strides = array<i32>} : memref<8x128xf32, #tpu.memory_space<vmem>>, vector<8x128xf32>,
    return
  }
  func.func @transform_0(%arg0: i32, %arg1: i32) -> (i32, i32) {
    %c1_i32 = arith.constant 1 : i32
    %0 = arith.muli %arg0, %c1_i32 : i32
    %1 = arith.addi %0, %arg1 : i32
    %c0_i32 = arith.constant 0 : i32
    %c0_i32_0 = arith.constant 0 : i32
    return %1, %c0_i32 : i32, i32
  }
  func.func @transform_1(%arg0: i32, %arg1: i32) -> (i32, i32) {
    %c1_i32 = arith.constant 1 : i32
    %0 = arith.muli %arg0, %c1_i32 : i32
    %1 = arith.addi %0, %arg1 : i32
    %c0_i32 = arith.constant 0 : i32
    %c0_i32_0 = arith.constant 0 : i32
    return %1, %c0_i32 : i32, i32
  }
  func.func @transform_2(%arg0: i32, %arg1: i32) -> (i32, i32) {
    %c0_i32 = arith.constant 0 : i32
    %c0_i32_0 = arith.constant 0 : i32
    return %arg0, %c0_i32 : i32, i32
  }
}

</mosaic_0001>

<bundles_post_ra>
// kernel: tpu_custom_call.1
= control target key start
LH: loop header
LB: loop body
LE: loop exit
PB: predicated region body
PF: predicated region fallthrough
CT: control target
= control target key end

     0   :  { %7 = vsyncpa [#allocation3], 0  ;;  %s249_s0 = inlined_call_operand.hbm [shape: f32[32,128], index: 0, kind: input, shape index: {}]   ;;  %s250_s1 = inlined_call_operand.hbm [shape: f32[32,128], index: 1, kind: input, shape index: {}]   ;;  %s251_s2 = inlined_call_operand.hbm [shape: f32[8,128], index: 2, kind: output, shape index: {}]  }
   0x1   :  { %8 = vsyncpa [#allocation6], 0 }
   0x2   :  { %9 = vsyncpa [#allocation4], 0  ;;  %s193_s9 = smov [#allocation2]   ;;  %s121_s13 = scalar_lea.hbm %s249_s0, 512 }
   0x3   :  { %s19_s10 = sshll.u32 %s193_s9, 4  ;;  %p122_p0 = scmp.ne.s32.totalorder %s249_s0, %s121_s13  ;;  %s20_s10 = int_to_ptr.vmem [resolvable:$true] %s19_s10 }
   0x4   :  { %p125_p1 = scmp.lt.u32.totalorder %s121_s13, %s249_s0 }
   0x6   :  { %p127_p2 = pnand %p125_p1, %p122_p0 }
   0x8   :  { %130 = shalt.err (!%p127_p2)
}
   0x9   :  { %s131_s18 = scalar_lea.vmem %s20_s10, 512  ;;  %p136_p4 = scmp.lt.s32.totalorder %s20_s10, %s20_s10 }
   0xa   :  { %p132_p3 = scmp.ne.s32.totalorder %s20_s10, %s131_s18  ;;  %p137_p5 = scmp.lt.s32.totalorder %s131_s18, %s131_s18 }
   0xc   :  { %p138_p6 = por %p137_p5, %p136_p4 }
   0xe   :  { %p139_p7 = pnand %p138_p6, %p132_p3 }
  0x10   :  { %142 = shalt.err (!%p139_p7)
}
  0x11   :  { %s194_s19 = smov 128   ;;  %s195_s20 = smov 8  }
  0x12   :  { %25 = dma.hbm_to_vmem [thread:$0]  %s249_s0, 512, %s20_s10, [#allocation3], %s194_s19, %s194_s19, %s195_s20  }
  0x13   :  { %s196_s23 = smov [#allocation5]   ;;  %s143_s27 = scalar_lea.hbm %s250_s1, 512 }
  0x14   :  { %s35_s24 = sshll.u32 %s196_s23, 4  ;;  %p144_p8 = scmp.ne.s32.totalorder %s250_s1, %s143_s27  ;;  %s36_s24 = int_to_ptr.vmem [resolvable:$true] %s35_s24 }
  0x15   :  { %p147_p9 = scmp.lt.u32.totalorder %s143_s27, %s250_s1 }
  0x17   :  { %p149_p10 = pnand %p147_p9, %p144_p8 }
  0x19   :  { %152 = shalt.err (!%p149_p10)
}
  0x1a   :  { %s153_s4 = scalar_lea.vmem %s36_s24, 512  ;;  %p158_p12 = scmp.lt.s32.totalorder %s36_s24, %s36_s24 }
  0x1b   :  { %p154_p11 = scmp.ne.s32.totalorder %s36_s24, %s153_s4  ;;  %p159_p13 = scmp.lt.s32.totalorder %s153_s4, %s153_s4 }
  0x1d   :  { %p160_p0 = por %p159_p13, %p158_p12 }
  0x1f   :  { %p161_p1 = pnand %p160_p0, %p154_p11 }
  0x21   :  { %164 = shalt.err (!%p161_p1)
}
  0x22   :  { %41 = dma.hbm_to_vmem [thread:$0]  %s250_s1, 512, %s36_s24, [#allocation6], %s194_s19, %s194_s19, %s195_s20  }
  0x23   :  { %187 = dma.done.wait [#allocation3], 512  }
  0x24   :  { %188 = vsyncadd [#allocation3], 4294966784 }
  0x25   :  { %189 = dma.done.wait [#allocation6], 512  }
  0x26   :  { %190 = vsyncadd [#allocation6], 4294966784  ;;  %v57_v0 = vld [vmem:[#allocation2] sm:$0xff]  ;;  %v58_v1 = vld [vmem:[#allocation2 + $0x8] sm:$0xff]  ;;  %s197_s1 = smov [#allocation7]  }
  0x27   :  { %v59_v2 = vld [vmem:[#allocation2 + $0x10] sm:$0xff]  ;;  %v60_v3 = vld [vmem:[#allocation2 + $0x18] sm:$0xff]  ;;  %v65_v4 = vsub.f32 2.0, %v57_v0  ;;  %v66_v5 = vsub.f32 2.0, %v58_v1  ;;  %v77_v8 = vmul.f32 %v57_v0, %v57_v0  ;;  %v78_v9 = vmul.f32 %v58_v1, %v58_v1  ;;  %v61_v19 = vld [vmem:[#allocation5] sm:$0xff]  ;;  %s105_s6 = sshll.u32 %s197_s1, 4  ;;  %s106_s6 = int_to_ptr.vmem [resolvable:$true] %s105_s6 }
  0x28   :  { %v67_v6 = vsub.f32 2.0, %v59_v2  ;;  %v68_v7 = vsub.f32 2.0, %v60_v3  ;;  %v79_v13 = vmul.f32 %v59_v2, %v59_v2  ;;  %v80_v15 = vmul.f32 %v60_v3, %v60_v3  ;;  %v62_v20 = vld [vmem:[#allocation5 + $0x8] sm:$0xff]  ;;  %v63_v21 = vld [vmem:[#allocation5 + $0x10] sm:$0xff]  ;;  %v64_v23 = vld [vmem:[#allocation5 + $0x18] sm:$0xff]  ;;  %s165_s7 = scalar_lea.vmem %s106_s6, 128  ;;  %p170_p3 = scmp.lt.s32.totalorder %s106_s6, %s106_s6 }
  0x29   :  { %v69_v10 = vmax.f32 %v65_v4, 0.0  ;;  %v70_v11 = vmax.f32 %v66_v5, 0.0  ;;  %p166_p2 = scmp.ne.s32.totalorder %s106_s6, %s165_s7  ;;  %p171_p4 = scmp.lt.s32.totalorder %s165_s7, %s165_s7 }
  0x2a   :  { %v71_v12 = vmax.f32 %v67_v6, 0.0  ;;  %v72_v14 = vmax.f32 %v68_v7, 0.0 }
  0x2b   :  { %v73_v16 = vmul.f32 %v69_v10, %v69_v10  ;;  %v74_v17 = vmul.f32 %v70_v11, %v70_v11  ;;  %p172_p5 = por %p171_p4, %p170_p3 }
  0x2c   :  { %v75_v18 = vmul.f32 %v71_v12, %v71_v12  ;;  %v76_v22 = vmul.f32 %v72_v14, %v72_v14 }
  0x2d   :  { %v81_v24 = vsub.f32 %v77_v8, %v73_v16  ;;  %v82_v25 = vsub.f32 %v78_v9, %v74_v17  ;;  %p173_p6 = pnand %p172_p5, %p166_p2 }
  0x2e   :  { %v83_v26 = vsub.f32 %v79_v13, %v75_v18  ;;  %v84_v27 = vsub.f32 %v80_v15, %v76_v22 }
  0x2f   :  { %v85_v28 = vmul.f32 %v81_v24, %v61_v19  ;;  %v86_v29 = vmul.f32 %v82_v25, %v62_v20 }
  0x30   :  { %v87_v30 = vmul.f32 %v83_v26, %v63_v21  ;;  %v88_v31 = vmul.f32 %v84_v27, %v64_v23 }
  0x31   :  { %v89_v32 = vadd.f32 %v85_v28, %v73_v16  ;;  %v90_v33 = vadd.f32 %v86_v29, %v74_v17 }
  0x32   :  { %v91_v34 = vadd.f32 %v87_v30, %v75_v18  ;;  %v92_v35 = vadd.f32 %v88_v31, %v76_v22 }
  0x33   :  { %v93_v36 = vadd.f32 %v90_v33, %v89_v32 }
  0x35   :  { %v94_v37 = vadd.f32 %v93_v36, %v91_v34 }
  0x37   :  { %v95_v38 = vadd.f32 %v94_v37, %v92_v35 }
  0x39   :  { %98 = vst [vmem:[#allocation7] sm:$0xff] %v95_v38 }
  0x3a   :  { %176 = shalt.err (!%p173_p6)
}
  0x3b   :  { %s177_s10 = scalar_lea.hbm %s251_s2, 128 }
  0x3c   :  { %p178_p7 = scmp.ne.s32.totalorder %s251_s2, %s177_s10  ;;  %p181_p8 = scmp.lt.u32.totalorder %s177_s10, %s251_s2 }
  0x3e   :  { %p183_p9 = pnand %p181_p8, %p178_p7 }
  0x40   :  { %186 = shalt.err (!%p183_p9)
}
  0x41   :  { %108 = dma.vmem_to_hbm [thread:$0]  %s106_s6, 128, %s251_s2, [#allocation4]  }
  0x42   :  { %191 = dma.done.wait [#allocation4], 128  }
  0x43   :  { %192 = vsyncadd [#allocation4], 4294967168 }
  0x44   :  { %112 = vsyncpa [#allocation3], 1 }
  0x45   :  { %113 = vsyncpa [#allocation6], 1 }
  0x46   :  { %114 = vsyncpa [#allocation4], 1 }

</bundles_post_ra>
